<compile_context>
chip_gen: v7x
topology: tpu7x:2x2x1
jax: 0.10.0
libtpu: 0.0.40
codegen_flags: <defaults>
</compile_context>

<pallas_src>
import functools
import math

import jax
import jax.numpy as jnp
from jax.experimental import pallas as pl
from jax.experimental.pallas import tpu as pltpu


def _direct_concat_kernel(*refs, num_features):
    # refs = (x_0, ..., x_{F-1}, w, b, o)
    #   x_i : VMEM (tile_m, D)    w : VMEM (F*D, D)   (= W.T)
    #   b   : VMEM (1, D)         o : VMEM (tile_m, D)
    x_refs = refs[:num_features]
    w_ref = refs[num_features]
    b_ref = refs[num_features + 1]
    o_ref = refs[num_features + 2]

    D = o_ref.shape[-1]

    if D % 128 == 0:
        # Tile-local concat in VMEM (never hits HBM); with D a lane multiple
        # this is just vreg placement.  Single MXU matmul with K = F*D.
        x_cat = jnp.concatenate([x[...] for x in x_refs], axis=-1)
        acc = jnp.dot(x_cat, w_ref[...], preferred_element_type=jnp.float32)
    else:
        # Avoid cross-lane relayout: sum of per-feature dots (mathematically
        # identical to the concatenated matmul).
        w = w_ref[...]
        acc = jnp.dot(x_refs[0][...], w[:D, :],
                      preferred_element_type=jnp.float32)
        for i in range(1, num_features):  # F is small & static -> unrolled
            acc = acc + jnp.dot(x_refs[i][...], w[i * D:(i + 1) * D, :],
                                preferred_element_type=jnp.float32)

    o_ref[...] = (acc + b_ref[...].astype(jnp.float32)).astype(o_ref.dtype)


def _choose_tile_m(M, D, num_features, io_bytes, w_bytes):
    # Budget (per TensorCore): resident weight/bias + double-buffered feature
    # and output blocks + in-kernel f32 temporaries (x_cat + accumulator) must
    # fit comfortably under the 32 MiB scoped-VMEM limit we request below.
    budget = 24 * 1024 * 1024
    resident = num_features * D * D * w_bytes + D * w_bytes
    avail = max(budget - resident, 2 * 1024 * 1024)

    bytes_per_row = 2 * (num_features + 1) * D * io_bytes   # double-buffered IO
    bytes_per_row += (num_features + 2) * D * 4              # x_cat + acc (f32)

    tile = avail // max(bytes_per_row, 1)
    tile = min(tile, 1024, M)   # cap rows; keeps several parallel grid steps
    if tile >= M:
        return M                # full extent is always a legal block shape
    return max(8, (tile // 8) * 8)  # keep the sublane dim a multiple of 8


def direct_concat(weight, bias, *features):
    """weight: (D, F*D) in PyTorch nn.Linear layout; bias: (D,);
    each feature: (..., D).  Returns (..., D)."""
    num_features = len(features)
    D = features[0].shape[-1]
    assert weight.shape == (D, D * num_features)
    assert bias.shape == (D,)
    leading = features[0].shape[:-1]
    M = math.prod(leading) if leading else 1
    out_dtype = features[0].dtype

    # Flatten every feature to (M, D); no concat / stack is materialized in HBM.
    xs = [f.reshape(M, D) for f in features]
    # Transposed weight (F*D, D); row block i corresponds to feature i.
    w_t = weight.T
    b2 = bias.reshape(1, D)

    io_bytes = jnp.dtype(out_dtype).itemsize
    w_bytes = jnp.dtype(weight.dtype).itemsize
    tile_m = _choose_tile_m(M, D, num_features, io_bytes, w_bytes)
    grid = (pl.cdiv(M, tile_m),)

    feat_spec = pl.BlockSpec((tile_m, D), lambda i: (i, 0))
    in_specs = (
        [feat_spec] * num_features
        + [
            pl.BlockSpec((num_features * D, D), lambda i: (0, 0)),  # resident W.T
            pl.BlockSpec((1, D), lambda i: (0, 0)),                 # resident bias
        ]
    )

    out_flat = pl.pallas_call(
        functools.partial(_direct_concat_kernel, num_features=num_features),
        out_shape=jax.ShapeDtypeStruct((M, D), out_dtype),
        grid_spec=pltpu.PrefetchScalarGridSpec(
            num_scalar_prefetch=0,
            grid=grid,
            in_specs=in_specs,
            out_specs=pl.BlockSpec((tile_m, D), lambda i: (i, 0)),
        ),
        compiler_params=pltpu.CompilerParams(
            dimension_semantics=("parallel",),
            vmem_limit_bytes=32 * 1024 * 1024,
        ),
    )(*xs, w_t, b2)

    return out_flat.reshape(*leading, D)


if __name__ == "__main__":
    key = jax.random.PRNGKey(0)

    feature_num = 4
    batch, seq, feature_dim = 2, 8, 128

    k_feat, k_w, k_b = jax.random.split(key, 3)
    feat_keys = jax.random.split(k_feat, feature_num)
    features = [
        jax.random.normal(k, (batch, seq, feature_dim), dtype=jnp.float32)
        for k in feat_keys
    ]

    # nn.Linear(feature_dim * feature_num, feature_dim) parameters (PyTorch init).
    fan_in = feature_dim * feature_num
    bound = 1.0 / math.sqrt(fan_in)
    weight = jax.random.uniform(
        k_w, (feature_dim, fan_in), minval=-bound, maxval=bound, dtype=jnp.float32
    )
    bias = jax.random.uniform(
        k_b, (feature_dim,), minval=-bound, maxval=bound, dtype=jnp.float32
    )

    out = direct_concat(weight, bias, *features)
    out = jax.block_until_ready(out)

    # Pure-JAX reference of the PyTorch forward.
    x_cat = jnp.concatenate(features, axis=-1)
    ref = x_cat @ weight.T + bias

    assert out.shape == (batch, seq, feature_dim)
    # Both paths use the MXU; accumulation order / pass structure may differ,
    # so allow a small tolerance.
    assert jnp.allclose(out, ref, atol=2e-2, rtol=2e-2), "mismatch vs reference"

    print("KERNEL_OK")
</pallas_src>

<mosaic_0001>
module attributes {stable_mosaic.version = 11 : i64} {
  func.func @_direct_concat_kernel(%arg0: i32, %arg1: memref<16x128xf32, #tpu.memory_space<vmem>>, %arg2: memref<16x128xf32, #tpu.memory_space<vmem>>, %arg3: memref<16x128xf32, #tpu.memory_space<vmem>>, %arg4: memref<16x128xf32, #tpu.memory_space<vmem>>, %arg5: memref<512x128xf32, #tpu.memory_space<vmem>>, %arg6: memref<1x128xf32, #tpu.memory_space<vmem>>, %arg7: memref<16x128xf32, #tpu.memory_space<vmem>>) attributes {dimension_semantics = [#tpu.dimension_semantics<parallel>], iteration_bounds = array<i64: 1>, scalar_prefetch = 0 : i64, scratch_operands = 0 : i64, tpu.core_type = #tpu.core_type<tc>, window_params = [{transform_indices = @transform_0, window_bounds = array<i64: 16, 128>}, {transform_indices = @transform_1, window_bounds = array<i64: 16, 128>}, {transform_indices = @transform_2, window_bounds = array<i64: 16, 128>}, {transform_indices = @transform_3, window_bounds = array<i64: 16, 128>}, {pipeline_mode = #tpu.pipeline_mode<synchronous>, transform_indices = @transform_4, window_bounds = array<i64: 512, 128>}, {pipeline_mode = #tpu.pipeline_mode<synchronous>, transform_indices = @transform_5, window_bounds = array<i64: 1, 128>}, {transform_indices = @transform_6, window_bounds = array<i64: 16, 128>}]} {
    %c0 = arith.constant 0 : index
    %c0_0 = arith.constant 0 : index
    %0 = vector.load %arg1[%c0, %c0_0] : memref<16x128xf32, #tpu.memory_space<vmem>>, vector<16x128xf32>
    %c0_1 = arith.constant 0 : index
    %c0_2 = arith.constant 0 : index
    %1 = vector.load %arg2[%c0_1, %c0_2] : memref<16x128xf32, #tpu.memory_space<vmem>>, vector<16x128xf32>
    %c0_3 = arith.constant 0 : index
    %c0_4 = arith.constant 0 : index
    %2 = vector.load %arg3[%c0_3, %c0_4] : memref<16x128xf32, #tpu.memory_space<vmem>>, vector<16x128xf32>
    %c0_5 = arith.constant 0 : index
    %c0_6 = arith.constant 0 : index
    %3 = vector.load %arg4[%c0_5, %c0_6] : memref<16x128xf32, #tpu.memory_space<vmem>>, vector<16x128xf32>
    %4 = tpu.concatenate %0, %1, %2, %3 in 1 : vector<16x128xf32>, vector<16x128xf32>, vector<16x128xf32>, vector<16x128xf32> -> vector<16x512xf32>
    %c0_7 = arith.constant 0 : index
    %c0_8 = arith.constant 0 : index
    %5 = vector.load %arg5[%c0_7, %c0_8] : memref<512x128xf32, #tpu.memory_space<vmem>>, vector<512x128xf32>
    %cst = arith.constant dense<0.000000e+00> : vector<16x128xf32>
    %6 = tpu.matmul %4, %5, %cst {dimension_numbers = #tpu.dot_dimension_numbers<[1], [0], [0], [1], [0, 0, 1, 1], [], []>} : vector<16x512xf32>, vector<512x128xf32>, vector<16x128xf32> -> vector<16x128xf32>
    %c0_9 = arith.constant 0 : index
    %c0_10 = arith.constant 0 : index
    %7 = vector.load %arg6[%c0_9, %c0_10] : memref<1x128xf32, #tpu.memory_space<vmem>>, vector<1x128xf32>
    %8 = vector.broadcast %7 : vector<1x128xf32> to vector<16x128xf32>
    %9 = arith.addf %6, %8 : vector<16x128xf32>
    %c0_11 = arith.constant 0 : index
    %c0_12 = arith.constant 0 : index
    %10 = vector.load %arg7[%c0_11, %c0_12] : memref<16x128xf32, #tpu.memory_space<vmem>>, vector<16x128xf32>
    tpu.vector_store %arg7[%c0_11, %c0_12], %9 {strides = array<i32>} : memref<16x128xf32, #tpu.memory_space<vmem>>, vector<16x128xf32>,
    return
  }
  func.func @transform_0(%arg0: i32) -> (i32, i32) {
    %c0_i32 = arith.constant 0 : i32
    %c0_i32_0 = arith.constant 0 : i32
    return %arg0, %c0_i32 : i32, i32
  }
  func.func @transform_1(%arg0: i32) -> (i32, i32) {
    %c0_i32 = arith.constant 0 : i32
    %c0_i32_0 = arith.constant 0 : i32
    return %arg0, %c0_i32 : i32, i32
  }
  func.func @transform_2(%arg0: i32) -> (i32, i32) {
    %c0_i32 = arith.constant 0 : i32
    %c0_i32_0 = arith.constant 0 : i32
    return %arg0, %c0_i32 : i32, i32
  }
  func.func @transform_3(%arg0: i32) -> (i32, i32) {
    %c0_i32 = arith.constant 0 : i32
    %c0_i32_0 = arith.constant 0 : i32
    return %arg0, %c0_i32 : i32, i32
  }
  func.func @transform_4(%arg0: i32) -> (i32, i32) {
    %c0_i32 = arith.constant 0 : i32
    %c0_i32_0 = arith.constant 0 : i32
    %c0_i32_1 = arith.constant 0 : i32
    return %c0_i32, %c0_i32_0 : i32, i32
  }
  func.func @transform_5(%arg0: i32) -> (i32, i32) {
    %c0_i32 = arith.constant 0 : i32
    %c0_i32_0 = arith.constant 0 : i32
    %c0_i32_1 = arith.constant 0 : i32
    return %c0_i32, %c0_i32_0 : i32, i32
  }
  func.func @transform_6(%arg0: i32) -> (i32, i32) {
    %c0_i32 = arith.constant 0 : i32
    %c0_i32_0 = arith.constant 0 : i32
    return %arg0, %c0_i32 : i32, i32
  }
}

</mosaic_0001>

<bundles_post_ra>
// kernel: tpu_custom_call.1
= control target key start
LH: loop header
LB: loop body
LE: loop exit
PB: predicated region body
PF: predicated region fallthrough
CT: control target
= control target key end

     0   :  { %11 = vsyncpa [#allocation3], 0  ;;  %s781_s0 = inlined_call_operand.hbm [shape: f32[16,128], index: 0, kind: input, shape index: {}]   ;;  %s782_s1 = inlined_call_operand.hbm [shape: f32[16,128], index: 1, kind: input, shape index: {}]   ;;  %s783_s2 = inlined_call_operand.hbm [shape: f32[16,128], index: 2, kind: input, shape index: {}]   ;;  %s784_s3 = inlined_call_operand.hbm [shape: f32[16,128], index: 3, kind: input, shape index: {}]   ;;  %s785_s4 = inlined_call_operand.hbm [shape: f32[512,128], index: 4, kind: input, shape index: {}]   ;;  %s786_s5 = inlined_call_operand.vmem [shape: f32[1,128], index: 5, kind: input, shape index: {}]   ;;  %s787_s6 = inlined_call_operand.hbm [shape: f32[16,128], index: 6, kind: output, shape index: {}]  }
   0x1   :  { %12 = vsyncpa [#allocation6], 0 }
   0x2   :  { %13 = vsyncpa [#allocation9], 0 }
   0x3   :  { %14 = vsyncpa [#allocation4], 0  ;;  %s631_s21 = smov [#allocation5]   ;;  %s632_s23 = smov [#allocation8]  }
   0x4   :  { %s32_s22 = sshll.u32 %s631_s21, 4  ;;  %s56_s24 = sshll.u32 %s632_s23, 4  ;;  %s33_s22 = int_to_ptr.vmem [resolvable:$true] %s32_s22  ;;  %s674_s24 = int_to_ptr.vmem [resolvable:$true] %s56_s24 }
   0x5   :  { %s491_s27 = scalar_lea.hbm %s782_s1, 256 }
   0x6   :  { %p492_p0 = scmp.ne.s32.totalorder %s782_s1, %s491_s27  ;;  %p495_p1 = scmp.lt.u32.totalorder %s491_s27, %s782_s1 }
   0x8   :  { %p497_p2 = pnand %p495_p1, %p492_p0 }
   0xa   :  { %500 = shalt.err (!%p497_p2)
}
   0xb   :  { %s501_s8 = scalar_lea.vmem %s33_s22, 256  ;;  %p506_p4 = scmp.lt.s32.totalorder %s33_s22, %s33_s22 }
   0xc   :  { %p502_p3 = scmp.ne.s32.totalorder %s33_s22, %s501_s8  ;;  %p507_p5 = scmp.lt.s32.totalorder %s501_s8, %s501_s8 }
   0xe   :  { %p508_p6 = por %p507_p5, %p506_p4 }
  0x10   :  { %p509_p7 = pnand %p508_p6, %p502_p3 }
  0x12   :  { %512 = shalt.err (!%p509_p7)
}
  0x13   :  { %s633_s9 = smov 128   ;;  %s634_s10 = smov 8  }
  0x14   :  { %38 = dma.hbm_to_vmem [thread:$0]  %s782_s1, 256, %s33_s22, [#allocation6], %s633_s9, %s633_s9, %s634_s10  }
  0x15   :  { %s513_s15 = scalar_lea.hbm %s784_s3, 256 }
  0x16   :  { %p514_p8 = scmp.ne.s32.totalorder %s784_s3, %s513_s15  ;;  %p517_p9 = scmp.lt.u32.totalorder %s513_s15, %s784_s3 }
  0x18   :  { %p519_p10 = pnand %p517_p9, %p514_p8 }
  0x1a   :  { %522 = shalt.err (!%p519_p10)
}
  0x1b   :  { %s523_s20 = scalar_lea.vmem %s674_s24, 256  ;;  %p528_p12 = scmp.lt.s32.totalorder %s674_s24, %s674_s24 }
  0x1c   :  { %p524_p11 = scmp.ne.s32.totalorder %s674_s24, %s523_s20  ;;  %p529_p13 = scmp.lt.s32.totalorder %s523_s20, %s523_s20 }
  0x1e   :  { %p530_p0 = por %p529_p13, %p528_p12 }
  0x20   :  { %p531_p1 = pnand %p530_p0, %p524_p11 }
  0x22   :  { %534 = shalt.err (!%p531_p1)
}
  0x23   :  { %62 = dma.hbm_to_vmem [thread:$0]  %s784_s3, 256, %s674_s24, [#allocation9], %s633_s9, %s633_s9, %s634_s10  }
  0x24   :  { %s635_s22 = smov [#allocation2]   ;;  %s636_s25 = smov [#allocation7]  }
  0x25   :  { %s20_s23 = sshll.u32 %s635_s22, 4  ;;  %s44_s26 = sshll.u32 %s636_s25, 4  ;;  %s21_s23 = int_to_ptr.vmem [resolvable:$true] %s20_s23  ;;  %s711_s26 = int_to_ptr.vmem [resolvable:$true] %s44_s26 }
  0x26   :  { %s535_s29 = scalar_lea.hbm %s781_s0, 256 }
  0x27   :  { %p536_p2 = scmp.ne.s32.totalorder %s781_s0, %s535_s29  ;;  %p539_p3 = scmp.lt.u32.totalorder %s535_s29, %s781_s0 }
  0x29   :  { %p541_p4 = pnand %p539_p3, %p536_p2 }
  0x2b   :  { %544 = shalt.err (!%p541_p4)
}
  0x2c   :  { %s545_s3 = scalar_lea.vmem %s21_s23, 256  ;;  %p550_p6 = scmp.lt.s32.totalorder %s21_s23, %s21_s23 }
  0x2d   :  { %p546_p5 = scmp.ne.s32.totalorder %s21_s23, %s545_s3  ;;  %p551_p7 = scmp.lt.s32.totalorder %s545_s3, %s545_s3 }
  0x2f   :  { %p552_p8 = por %p551_p7, %p550_p6 }
  0x31   :  { %p553_p9 = pnand %p552_p8, %p546_p5 }
  0x33   :  { %556 = shalt.err (!%p553_p9)
}
  0x34   :  { %26 = dma.hbm_to_vmem [thread:$0]  %s781_s0, 256, %s21_s23, [#allocation3], %s633_s9, %s633_s9, %s634_s10  }
  0x35   :  { %s557_s15 = scalar_lea.hbm %s783_s2, 256 }
  0x36   :  { %p558_p10 = scmp.ne.s32.totalorder %s783_s2, %s557_s15  ;;  %p561_p11 = scmp.lt.u32.totalorder %s557_s15, %s783_s2 }
  0x38   :  { %p563_p12 = pnand %p561_p11, %p558_p10 }
  0x3a   :  { %566 = shalt.err (!%p563_p12)
}
  0x3b   :  { %s567_s20 = scalar_lea.vmem %s711_s26, 256  ;;  %p572_p0 = scmp.lt.s32.totalorder %s711_s26, %s711_s26 }
  0x3c   :  { %p568_p13 = scmp.ne.s32.totalorder %s711_s26, %s567_s20  ;;  %p573_p1 = scmp.lt.s32.totalorder %s567_s20, %s567_s20 }
  0x3e   :  { %p574_p2 = por %p573_p1, %p572_p0 }
  0x40   :  { %p575_p3 = pnand %p574_p2, %p568_p13 }
  0x42   :  { %578 = shalt.err (!%p575_p3)
}
  0x43   :  { %50 = dma.hbm_to_vmem [thread:$0]  %s783_s2, 256, %s711_s26, [#allocation6], %s633_s9, %s633_s9, %s634_s10  }
  0x44   :  { %s637_s21 = smov [#allocation10]   ;;  %s579_s27 = scalar_lea.hbm %s785_s4, 8192 }
  0x45   :  { %s68_s22 = sshll.u32 %s637_s21, 4  ;;  %p580_p4 = scmp.ne.s32.totalorder %s785_s4, %s579_s27  ;;  %s69_s22 = int_to_ptr.vmem [resolvable:$true] %s68_s22 }
  0x46   :  { %p583_p5 = scmp.lt.u32.totalorder %s579_s27, %s785_s4 }
  0x48   :  { %p585_p6 = pnand %p583_p5, %p580_p4 }
  0x4a   :  { %588 = shalt.err (!%p585_p6)
}
  0x4b   :  { %s589_s8 = scalar_lea.vmem %s69_s22, 8192  ;;  %p594_p8 = scmp.lt.s32.totalorder %s69_s22, %s69_s22 }
  0x4c   :  { %p590_p7 = scmp.ne.s32.totalorder %s69_s22, %s589_s8  ;;  %p595_p9 = scmp.lt.s32.totalorder %s589_s8, %s589_s8 }
  0x4e   :  { %p596_p10 = por %p595_p9, %p594_p8 }
  0x50   :  { %p597_p11 = pnand %p596_p10, %p590_p7 }
  0x52   :  { %600 = shalt.err (!%p597_p11)
}
  0x53   :  { %74 = dma.hbm_to_vmem [thread:$0]  %s785_s4, 8192, %s69_s22, [#allocation9], %s633_s9, %s633_s9, %s634_s10  }
  0x54   :  { %623 = dma.done.wait [#allocation3], 256  }
  0x55   :  { %624 = vsyncadd [#allocation3], 4294967040 }
  0x56   :  { %625 = dma.done.wait [#allocation6], 512  }
  0x57   :  { %626 = vsyncadd [#allocation6], 4294966784 }
  0x58   :  { %627 = dma.done.wait [#allocation9], 8448  }
  0x59   :  { %628 = vsyncadd [#allocation9], 4294958848  ;;  %v116_v0 = vld [vmem:[#allocation10 + $0x80] sm:$0xff]  ;;  %v117_v1 = vld [vmem:[#allocation10 + $0x88] sm:$0xff]  ;;  %s638_s3 = smov [#allocation11]  }
  0x5a   :  { %v100_v2 = vld [vmem:[#allocation10] sm:$0xff]  ;;  %v419_v3 = vpack.c.bf16 %v117_v1, %v116_v0  ;;  %v101_v4 = vld [vmem:[#allocation10 + $0x8] sm:$0xff]  ;;  %v118_v11 = vld [vmem:[#allocation10 + $0x90] sm:$0xff]  ;;  %s328_s24 = sshll.u32 %s638_s3, 4  ;;  %s329_s24 = int_to_ptr.vmem [resolvable:$true] %s328_s24 }
  0x5b   :  { %v148_v5 = vld [vmem:[#allocation10 + $0x180] sm:$0xff]  ;;  %v149_v6 = vld [vmem:[#allocation10 + $0x188] sm:$0xff]  ;;  %v421_v7 = vpack.c.bf16 %v101_v4, %v100_v2  ;;  %v119_v13 = vld [vmem:[#allocation10 + $0x98] sm:$0xff]  ;;  %p606_p13 = scmp.lt.s32.totalorder %s329_s24, %s329_s24 }
  0x5c   :  { %v451_v8 = vpack.c.bf16 %v149_v6, %v148_v5  ;;  %v132_v9 = vld [vmem:[#allocation10 + $0x100] sm:$0xff]  ;;  %v133_v10 = vld [vmem:[#allocation10 + $0x108] sm:$0xff]  ;;  %420 = vmatprep.subr.bf16.mxu0 %v419_v3  ;;  %v102_v14 = vld [vmem:[#allocation10 + $0x10] sm:$0xff]  ;;  %v423_v16 = vpack.c.bf16 %v119_v13, %v118_v11 }
  0x5d   :  { %v453_v12 = vpack.c.bf16 %v133_v10, %v132_v9  ;;  %v103_v15 = vld [vmem:[#allocation10 + $0x18] sm:$0xff]  ;;  %422 = vmatpush3.bf16.msra.mxu0 %v421_v7  ;;  %v150_v18 = vld [vmem:[#allocation10 + $0x190] sm:$0xff]  ;;  %v120_v23 = vld [vmem:[#allocation10 + $0xa0] sm:$0xff] }
  0x5e   :  { %452 = vmatprep.subr.bf16.mxu1 %v451_v8  ;;  %v425_v17 = vpack.c.bf16 %v103_v15, %v102_v14  ;;  %v151_v19 = vld [vmem:[#allocation10 + $0x198] sm:$0xff]  ;;  %v134_v20 = vld [vmem:[#allocation10 + $0x110] sm:$0xff]  ;;  %v121_v24 = vld [vmem:[#allocation10 + $0xa8] sm:$0xff]  ;;  %424 = vmatprep.subr.bf16.mxu0 %v423_v16 }
  0x5f   :  { %454 = vmatpush3.bf16.msra.mxu1 %v453_v12  ;;  %v455_v21 = vpack.c.bf16 %v151_v19, %v150_v18  ;;  %v135_v22 = vld [vmem:[#allocation10 + $0x118] sm:$0xff]  ;;  %v427_v26 = vpack.c.bf16 %v121_v24, %v120_v23  ;;  %v104_v27 = vld [vmem:[#allocation10 + $0x20] sm:$0xff]  ;;  %v105_v28 = vld [vmem:[#allocation10 + $0x28] sm:$0xff] }
  0x60   :  { %v457_v25 = vpack.c.bf16 %v135_v22, %v134_v20  ;;  %v152_v29 = vld [vmem:[#allocation10 + $0x1a0] sm:$0xff]  ;;  %v153_v30 = vld [vmem:[#allocation10 + $0x1a8] sm:$0xff]  ;;  %v429_v33 = vpack.c.bf16 %v105_v28, %v104_v27  ;;  %v122_v35 = vld [vmem:[#allocation10 + $0xb0] sm:$0xff] }
  0x61   :  { %456 = vmatprep.subr.bf16.mxu1 %v455_v21  ;;  %v136_v31 = vld [vmem:[#allocation10 + $0x120] sm:$0xff]  ;;  %v137_v32 = vld [vmem:[#allocation10 + $0x128] sm:$0xff]  ;;  %426 = vmatpush3.bf16.msra.mxu0 %v425_v17  ;;  %v459_v34 = vpack.c.bf16 %v153_v30, %v152_v29  ;;  %v123_v36 = vld [vmem:[#allocation10 + $0xb8] sm:$0xff] }
  0x62   :  { %v106_v37 = vld [vmem:[#allocation10 + $0x30] sm:$0xff]  ;;  %428 = vmatprep.subr.bf16.mxu0 %v427_v26  ;;  %v461_v38 = vpack.c.bf16 %v137_v32, %v136_v31  ;;  %v431_v39 = vpack.c.bf16 %v123_v36, %v122_v35  ;;  %v107_v40 = vld [vmem:[#allocation10 + $0x38] sm:$0xff]  ;;  %v124_v46 = vld [vmem:[#allocation10 + $0xc0] sm:$0xff] }
  0x63   :  { %458 = vmatpush3.bf16.msra.mxu1 %v457_v25  ;;  %v154_v41 = vld [vmem:[#allocation10 + $0x1b0] sm:$0xff]  ;;  %v155_v42 = vld [vmem:[#allocation10 + $0x1b8] sm:$0xff]  ;;  %v125_v47 = vld [vmem:[#allocation10 + $0xc8] sm:$0xff]  ;;  %v433_v48 = vpack.c.bf16 %v107_v40, %v106_v37 }
  0x64   :  { %460 = vmatprep.subr.bf16.mxu1 %v459_v34  ;;  %v463_v43 = vpack.c.bf16 %v155_v42, %v154_v41  ;;  %v138_v44 = vld [vmem:[#allocation10 + $0x130] sm:$0xff]  ;;  %v139_v45 = vld [vmem:[#allocation10 + $0x138] sm:$0xff]  ;;  %v156_v49 = vld [vmem:[#allocation10 + $0x1c0] sm:$0xff]  ;;  %v435_v52 = vpack.c.bf16 %v125_v47, %v124_v46 }
  0x65   :  { %430 = vmatpush3.bf16.msra.mxu0 %v429_v33  ;;  %v157_v50 = vld [vmem:[#allocation10 + $0x1c8] sm:$0xff]  ;;  %v465_v51 = vpack.c.bf16 %v139_v45, %v138_v44  ;;  %v108_v53 = vld [vmem:[#allocation10 + $0x40] sm:$0xff]  ;;  %v126_v58 = vld [vmem:[#allocation10 + $0xd0] sm:$0xff] }
  0x66   :  { %432 = vmatprep.subr.bf16.mxu0 %v431_v39  ;;  %v109_v54 = vld [vmem:[#allocation10 + $0x48] sm:$0xff]  ;;  %v140_v55 = vld [vmem:[#allocation10 + $0x140] sm:$0xff]  ;;  %v467_v56 = vpack.c.bf16 %v157_v50, %v156_v49  ;;  %v127_v59 = vld [vmem:[#allocation10 + $0xd8] sm:$0xff] }
  0x67   :  { %462 = vmatpush3.bf16.msra.mxu1 %v461_v38  ;;  %v141_v57 = vld [vmem:[#allocation10 + $0x148] sm:$0xff]  ;;  %v158_v60 = vld [vmem:[#allocation10 + $0x1d0] sm:$0xff]  ;;  %v159_v61 = vld [vmem:[#allocation10 + $0x1d8] sm:$0xff]  ;;  %v437_v62 = vpack.c.bf16 %v109_v54, %v108_v53  ;;  %v439_v0 = vpack.c.bf16 %v127_v59, %v126_v58 }
  0x68   :  { %464 = vmatprep.subr.bf16.mxu1 %v463_v43  ;;  %v469_v63 = vpack.c.bf16 %v141_v57, %v140_v55  ;;  %v110_v1 = vld [vmem:[#allocation10 + $0x50] sm:$0xff]  ;;  %v111_v2 = vld [vmem:[#allocation10 + $0x58] sm:$0xff]  ;;  %v471_v4 = vpack.c.bf16 %v159_v61, %v158_v60  ;;  %v128_v6 = vld [vmem:[#allocation10 + $0xe0] sm:$0xff] }
  0x69   :  { %434 = vmatpush3.bf16.msra.mxu0 %v433_v48  ;;  %v142_v3 = vld [vmem:[#allocation10 + $0x150] sm:$0xff]  ;;  %v143_v5 = vld [vmem:[#allocation10 + $0x158] sm:$0xff]  ;;  %v129_v7 = vld [vmem:[#allocation10 + $0xe8] sm:$0xff]  ;;  %v441_v10 = vpack.c.bf16 %v111_v2, %v110_v1 }
  0x6a   :  { %436 = vmatprep.subr.bf16.mxu0 %v435_v52  ;;  %v160_v8 = vld [vmem:[#allocation10 + $0x1e0] sm:$0xff]  ;;  %v161_v9 = vld [vmem:[#allocation10 + $0x1e8] sm:$0xff]  ;;  %v473_v13 = vpack.c.bf16 %v143_v5, %v142_v3  ;;  %v443_v14 = vpack.c.bf16 %v129_v7, %v128_v6  ;;  %v94_v17 = vld [vmem:[#allocation5] sm:$0xff] }
  0x6b   :  { %466 = vmatpush3.bf16.msra.mxu1 %v465_v51  ;;  %v112_v11 = vld [vmem:[#allocation10 + $0x60] sm:$0xff]  ;;  %v113_v12 = vld [vmem:[#allocation10 + $0x68] sm:$0xff]  ;;  %v475_v18 = vpack.c.bf16 %v161_v9, %v160_v8  ;;  %v130_v19 = vld [vmem:[#allocation10 + $0xf0] sm:$0xff]  ;;  %235 = vmatprep.mubr.f32.mxu0 %v94_v17 }
  0x6c   :  { %468 = vmatprep.subr.bf16.mxu1 %v467_v56  ;;  %v144_v15 = vld [vmem:[#allocation10 + $0x160] sm:$0xff]  ;;  %v145_v16 = vld [vmem:[#allocation10 + $0x168] sm:$0xff]  ;;  %v131_v20 = vld [vmem:[#allocation10 + $0xf8] sm:$0xff]  ;;  %v445_v24 = vpack.c.bf16 %v113_v12, %v112_v11 }
  0x6d   :  { %438 = vmatpush3.bf16.msra.mxu0 %v437_v62  ;;  %v98_v21 = vld [vmem:[#allocation8] sm:$0xff]  ;;  %v163_v23 = vld [vmem:[#allocation10 + $0x1f8] sm:$0xff]  ;;  %v477_v25 = vpack.c.bf16 %v145_v16, %v144_v15  ;;  %v447_v26 = vpack.c.bf16 %v131_v20, %v130_v19  ;;  %v92_v34 = vld [vmem:[#allocation2] sm:$0xff] }
  0x6e   :  { %440 = vmatprep.subr.bf16.mxu0 %v439_v0  ;;  %v162_v22 = vld [vmem:[#allocation10 + $0x1f0] sm:$0xff]  ;;  %310 = vmatprep.mubr.f32.mxu1 %v98_v21  ;;  %v115_v28 = vld [vmem:[#allocation10 + $0x78] sm:$0xff]  ;;  %v96_v35 = vld [vmem:[#allocation7] sm:$0xff] }
  0x6f   :  { %470 = vmatpush3.bf16.msra.mxu1 %v469_v63  ;;  %v114_v27 = vld [vmem:[#allocation10 + $0x70] sm:$0xff]  ;;  %v479_v29 = vpack.c.bf16 %v163_v23, %v162_v22  ;;  %v147_v31 = vld [vmem:[#allocation10 + $0x178] sm:$0xff]  ;;  %v93_v38 = vld [vmem:[#allocation2 + $0x8] sm:$0xff] }
  0x70   :  { %472 = vmatprep.subr.bf16.mxu1 %v471_v4  ;;  %v146_v30 = vld [vmem:[#allocation10 + $0x170] sm:$0xff]  ;;  %v449_v32 = vpack.c.bf16 %v115_v28, %v114_v27  ;;  %v95_v36 = vld [vmem:[#allocation5 + $0x8] sm:$0xff]  ;;  %v97_v39 = vld [vmem:[#allocation7 + $0x8] sm:$0xff] }
  0x71   :  { %442 = vmatpush3.bf16.msra.mxu0 %v441_v10  ;;  %v481_v33 = vpack.c.bf16 %v147_v31, %v146_v30  ;;  %v99_v37 = vld [vmem:[#allocation8 + $0x8] sm:$0xff]  ;;  %v342_v41 = vld [vmem:[%s786_s5] ss:$0 sm:$0xff]  ;;  %s601_s5 = scalar_lea.vmem %s329_s24, 256 }
  0x72   :  { %444 = vmatprep.subr.bf16.mxu0 %v443_v14  ;;  %p602_p12 = scmp.ne.s32.totalorder %s329_s24, %s601_s5  ;;  %p607_p0 = scmp.lt.s32.totalorder %s601_s5, %s601_s5 }
  0x73   :  { %474 = vmatpush3.bf16.msra.mxu1 %v473_v13 }
  0x74   :  { %476 = vmatprep.subr.bf16.mxu1 %v475_v18  ;;  %p608_p1 = por %p607_p0, %p606_p13 }
  0x75   :  { %446 = vmatpush3.bf16.msra.mxu0 %v445_v24 }
  0x76   :  { %448 = vmatprep.subr.bf16.mxu0 %v447_v26  ;;  %p609_p2 = pnand %p608_p1, %p602_p12 }
  0x77   :  { %478 = vmatpush3.bf16.msra.mxu1 %v477_v25 }
  0x78   :  { %480 = vmatprep.subr.bf16.mxu1 %v479_v29 }
  0x79   :  { %450 = vmatpush3.bf16.msra.mxu0 %v449_v32 }
  0x7b   :  { %482 = vmatpush3.bf16.msra.mxu1 %v481_v33 }
  0x7c   :  { %236 = vmatmul.mubr.f32.vlgmr.msra.gmra.mrb[0].mxu0 %v92_v34 }
  0x7d   :  { %240 = vmatprep.mubr.f32.mxu0 %v95_v36 }
  0x7e   :  { %311 = vmatmul.mubr.f32.vlgmr.msra.gmra.mrb[0].mxu1 %v96_v35 }
  0x7f   :  { %315 = vmatprep.mubr.f32.mxu1 %v99_v37 }
  0x80   :  { %241 = vmatmul.mubr.f32.gmra.mrb[2].mxu0 %v93_v38 }
  0x82   :  { %316 = vmatmul.mubr.f32.gmra.mrb[2].mxu1 %v97_v39 }
 0x14f   :  { %v375_v40 = vpop.f32.mrb[0].mxu0 }
 0x150   :  { %v376_v42 = vpop.f32.mrb[1].mxu0 }
 0x151   :  { %v413_v43 = vpop.f32.mrb[0].mxu1  ;;  %v377_v44 = vadd.f32 %v376_v42, %v375_v40 }
 0x152   :  { %v414_v45 = vpop.f32.mrb[1].mxu1 }
 0x153   :  { %v415_v46 = vadd.f32 %v414_v45, %v413_v43  ;;  %v238_v47 = vadd.f32 %v377_v44, %v342_v41  ;;  %v378_v48 = vpop.f32.mrb[2].mxu0 }
 0x154   :  { %v379_v49 = vpop.f32.mrb[3].mxu0 }
 0x155   :  { %v416_v50 = vpop.f32.mrb[2].mxu1  ;;  %v313_v51 = vadd.f32 %v415_v46, %v238_v47  ;;  %v380_v52 = vadd.f32 %v379_v49, %v378_v48 }
 0x156   :  { %v417_v53 = vpop.f32.mrb[3].mxu1 }
 0x157   :  { %v418_v54 = vadd.f32 %v417_v53, %v416_v50  ;;  %321 = vst [vmem:[#allocation11] sm:$0xff] %v313_v51  ;;  %v243_v55 = vadd.f32 %v380_v52, %v342_v41 }
 0x159   :  { %v318_v56 = vadd.f32 %v418_v54, %v243_v55 }
 0x15b   :  { %322 = vst [vmem:[#allocation11 + $0x8] sm:$0xff] %v318_v56 }
 0x15c   :  { %612 = shalt.err (!%p609_p2)
}
 0x15d   :  { %s613_s14 = scalar_lea.hbm %s787_s6, 256 }
 0x15e   :  { %p614_p3 = scmp.ne.s32.totalorder %s787_s6, %s613_s14  ;;  %p617_p4 = scmp.lt.u32.totalorder %s613_s14, %s787_s6 }
 0x160   :  { %p619_p5 = pnand %p617_p4, %p614_p3 }
 0x162   :  { %622 = shalt.err (!%p619_p5)
}
 0x163   :  { %334 = dma.vmem_to_hbm [thread:$0]  %s329_s24, 256, %s787_s6, [#allocation4], %s633_s9, %s633_s9, %s634_s10  }
 0x164   :  { %629 = dma.done.wait [#allocation4], 256  }
 0x165   :  { %630 = vsyncadd [#allocation4], 4294967040 }
 0x166   :  { %338 = vsyncpa [#allocation3], 1 }
 0x167   :  { %339 = vsyncpa [#allocation6], 1 }
 0x168   :  { %340 = vsyncpa [#allocation9], 1 }
 0x169   :  { %341 = vsyncpa [#allocation4], 1 }

</bundles_post_ra>
